<compile_context>
chip_gen: v7x
topology: tpu7x:2x2x1
jax: 0.10.0
libtpu: 0.0.40
codegen_flags: <defaults>
</compile_context>

<pallas_src>
import functools

import numpy as np
import jax
import jax.numpy as jnp
from jax.experimental import pallas as pl
from jax.experimental.pallas import tpu as pltpu


def make_divisible(x, divisible_by=8):
    return int(np.ceil(x * 1.0 / divisible_by) * divisible_by)


def _tpu_chip_info():
    """Best-effort (is_v7x, physical_vmem_bytes, tensorcores_per_chip)."""
    kind = ""
    try:
        kind = jax.devices()[0].device_kind.lower()
    except Exception:
        pass
    is_v7x = ("v7" in kind) or ("tpu7" in kind) or ("7x" in kind)
    if is_v7x:
        return True, 64 << 20, 2
    return False, 128 << 20, 1


def _pick_block_batch(N, C, HW, dtype_bytes, budget_bytes, min_grid_steps):
    """Largest TB dividing N whose double-buffered in+out working set fits the
    budget while keeping at least `min_grid_steps` grid steps (only >1 on the
    2-TensorCore v7x; on 1-TC chips forcing extra steps just shrinks DMA tiles)."""
    best = 1
    for tb in range(1, N + 1):
        if N % tb:
            continue
        working_set = 2 * 2 * tb * C * HW * dtype_bytes  # 2 bufs x (in + out)
        if working_set > budget_bytes:
            break
        if N // tb < min_grid_steps:
            continue
        best = tb
    return best


def se_kernel(x_ref, w1t_ref, b1_ref, w2t_ref, b2_ref, o_ref, *, inv_hw):
    # x_ref / o_ref: (TB, C, HW)   w1t_ref: (C, Cmid)   b1_ref: (1, Cmid)
    # w2t_ref: (Cmid, C)           b2_ref: (1, C)

    # squeeze: f32-accumulated sum over the spatial lanes * 1/HW (no padding,
    # Mosaic masks the lane tail of the logical extent).
    pooled = jnp.sum(x_ref[...], axis=2, dtype=jnp.float32) * inv_hw    # (TB, C)

    # excite: 1x1 conv (C -> Cmid) + relu    (M = TB rows on the MXU)
    h = jnp.dot(pooled, w1t_ref[...], preferred_element_type=jnp.float32)
    h = jnp.maximum(h + b1_ref[...], 0.0)                               # (TB, Cmid)

    # 1x1 conv (Cmid -> C) + hard_sigmoid = relu6(x + 3) / 6
    s = jnp.dot(h, w2t_ref[...], preferred_element_type=jnp.float32)
    s = s + b2_ref[...]
    s = jnp.minimum(jnp.maximum(s + 3.0, 0.0), 6.0) * (1.0 / 6.0)       # (TB, C) f32

    # scale: broadcast hoisted once; x_ref is re-read from VMEM for the store so
    # the whole tile is never one long-lived register value (no spill pressure).
    scale = s.astype(o_ref.dtype)[:, :, None]                           # (TB, C, 1)
    o_ref[...] = x_ref[...] * scale


def se_forward(x_nchw, w1, b1, w2, b2, *, block_budget_bytes=None,
               vmem_limit_bytes=None):
    """x_nchw: (N, C, H, W). w1: (Cmid, C), b1: (Cmid,), w2: (C, Cmid), b2: (C,)."""
    N, C, H, W = x_nchw.shape
    Cmid = w1.shape[0]
    HW = H * W
    dtype_bytes = jnp.dtype(x_nchw.dtype).itemsize

    is_v7x, _vmem_phys, n_cores = _tpu_chip_info()

    # Generation-gated budgets: v5e/v6e have 128 MiB VMEM -> big tiles amortize
    # per-step overhead and hit the HBM roofline; v7x has only 64 MiB -> keep
    # headroom so both in and out blocks stay double-buffered.
    if block_budget_bytes is None:
        block_budget_bytes = (24 << 20) if is_v7x else (32 << 20)

    x = x_nchw.reshape(N, C, HW)                 # no jnp.pad: no extra HBM pass

    min_steps = 2 if (is_v7x and N >= 2) else 1  # >=2 steps only where 2 TCs exist
    TB = _pick_block_batch(N, C, HW, dtype_bytes, block_budget_bytes, min_steps)
    grid = (N // TB,)

    # pre-transpose the tiny weights so the kernel does plain row-major matmuls
    w1t = w1.T                                   # (C, Cmid)
    w2t = w2.T                                   # (Cmid, C)
    b1r = b1.reshape(1, Cmid).astype(jnp.float32)
    b2r = b2.reshape(1, C).astype(jnp.float32)

    block_bytes = 2 * 2 * TB * C * HW * dtype_bytes
    weight_bytes = 4 * (w1t.size + w2t.size + b1r.size + b2r.size)
    if vmem_limit_bytes is None:
        lo, hi = ((16 << 20), (48 << 20)) if is_v7x else ((32 << 20), (96 << 20))
        vmem_limit_bytes = int(min(max(block_bytes + weight_bytes + (4 << 20), lo), hi))

    # On v7x, explicitly shard the batch axis across the 2 TensorCores; plain
    # "parallel" does not change codegen for core splitting.
    if is_v7x and n_cores >= 2 and grid[0] >= 2 and grid[0] % n_cores == 0:
        dim_sem = (pltpu.CORE_PARALLEL,)
    else:
        dim_sem = ("parallel",)

    cost = pl.CostEstimate(
        flops=4 * N * C * Cmid + 2 * N * C * HW,
        transcendentals=0,
        bytes_accessed=2 * N * C * HW * dtype_bytes + weight_bytes,
    )

    kernel = functools.partial(se_kernel, inv_hw=1.0 / HW)

    out = pl.pallas_call(
        kernel,
        out_shape=jax.ShapeDtypeStruct((N, C, HW), x_nchw.dtype),
        grid_spec=pltpu.PrefetchScalarGridSpec(
            num_scalar_prefetch=0,
            grid=grid,
            in_specs=[
                pl.BlockSpec((TB, C, HW), lambda b: (b, 0, 0)),   # x (TB imgs/step)
                pl.BlockSpec((C, Cmid), lambda b: (0, 0)),        # w1^T
                pl.BlockSpec((1, Cmid), lambda b: (0, 0)),        # b1
                pl.BlockSpec((Cmid, C), lambda b: (0, 0)),        # w2^T
                pl.BlockSpec((1, C), lambda b: (0, 0)),           # b2
            ],
            out_specs=pl.BlockSpec((TB, C, HW), lambda b: (b, 0, 0)),
        ),
        compiler_params=pltpu.CompilerParams(
            dimension_semantics=dim_sem,
            vmem_limit_bytes=vmem_limit_bytes,
        ),
        cost_estimate=cost,
    )(x, w1t, b1r, w2t, b2r)

    return out.reshape(N, C, H, W)


def se_reference(x_nchw, w1, b1, w2, b2):
    """Plain-JAX reference matching the PyTorch SE forward."""
    pooled = jnp.mean(x_nchw, axis=(2, 3))                           # (N, C)
    h = jnp.maximum(pooled @ w1.T + b1, 0.0)                         # (N, Cmid)
    s = h @ w2.T + b2                                                # (N, C)
    s = jnp.minimum(jnp.maximum(s + 3.0, 0.0), 6.0) / 6.0
    return x_nchw * s[:, :, None, None]


if __name__ == "__main__":
    key = jax.random.PRNGKey(0)

    # Two small cases consistent with the module:
    #  - 14x14 spatial (HW = 196, NOT a multiple of 128) validates the
    #    un-padded ragged-lane reduce/store path.
    #  - 8x8 spatial (HW = 64 < 128) validates the tiny-spatial path.
    cases = [
        (2, 16, 14, 14),
        (2, 16, 8, 8),
    ]
    ratio = 4

    for (N, C, H, W) in cases:
        Cmid = make_divisible(C // ratio)
        key, kx, k1, kb1, k2, kb2 = jax.random.split(key, 6)

        x = jax.random.normal(kx, (N, C, H, W), dtype=jnp.float32)
        # deterministic synthetic parameters (1x1 conv weights == dense matrices)
        w1 = jax.random.normal(k1, (Cmid, C), dtype=jnp.float32) * 0.1   # conv1 weight
        b1 = jax.random.normal(kb1, (Cmid,), dtype=jnp.float32) * 0.1    # conv1 bias
        w2 = jax.random.normal(k2, (C, Cmid), dtype=jnp.float32) * 0.1   # conv2 weight
        b2 = jax.random.normal(kb2, (C,), dtype=jnp.float32) * 0.1       # conv2 bias

        out = jax.block_until_ready(se_forward(x, w1, b1, w2, b2))
        ref = se_reference(x, w1, b1, w2, b2)
        np.testing.assert_allclose(np.asarray(out), np.asarray(ref),
                                   rtol=1e-5, atol=1e-5)

    print("KERNEL_OK")
</pallas_src>

<mosaic_0001>
module attributes {stable_mosaic.version = 11 : i64} {
  func.func @se_kernel(%arg0: i32, %arg1: memref<2x16x196xf32, #tpu.memory_space<vmem>>, %arg2: memref<16x8xf32, #tpu.memory_space<vmem>>, %arg3: memref<1x8xf32, #tpu.memory_space<vmem>>, %arg4: memref<8x16xf32, #tpu.memory_space<vmem>>, %arg5: memref<1x16xf32, #tpu.memory_space<vmem>>, %arg6: memref<2x16x196xf32, #tpu.memory_space<vmem>>) attributes {dimension_semantics = [#tpu.dimension_semantics<parallel>], iteration_bounds = array<i64: 1>, scalar_prefetch = 0 : i64, scratch_operands = 0 : i64, tpu.core_type = #tpu.core_type<tc>, window_params = [{transform_indices = @transform_0, window_bounds = array<i64: 2, 16, 196>}, {pipeline_mode = #tpu.pipeline_mode<synchronous>, transform_indices = @transform_1, window_bounds = array<i64: 16, 8>}, {pipeline_mode = #tpu.pipeline_mode<synchronous>, transform_indices = @transform_2, window_bounds = array<i64: 1, 8>}, {pipeline_mode = #tpu.pipeline_mode<synchronous>, transform_indices = @transform_3, window_bounds = array<i64: 8, 16>}, {pipeline_mode = #tpu.pipeline_mode<synchronous>, transform_indices = @transform_4, window_bounds = array<i64: 1, 16>}, {transform_indices = @transform_5, window_bounds = array<i64: 2, 16, 196>}]} {
    %c0 = arith.constant 0 : index
    %c0_0 = arith.constant 0 : index
    %c0_1 = arith.constant 0 : index
    %0 = vector.load %arg1[%c0, %c0_0, %c0_1] : memref<2x16x196xf32, #tpu.memory_space<vmem>>, vector<2x16x196xf32>
    %cst = arith.constant dense<0.000000e+00> : vector<2x16xf32>
    %1 = vector.multi_reduction <add>, %0, %cst [2] : vector<2x16x196xf32> to vector<2x16xf32>
    %cst_2 = arith.constant 0.00510204071 : f32
    %2 = vector.broadcast %cst_2 : f32 to vector<2x16xf32>
    %3 = arith.mulf %1, %2 : vector<2x16xf32>
    %c0_3 = arith.constant 0 : index
    %c0_4 = arith.constant 0 : index
    %4 = vector.load %arg2[%c0_3, %c0_4] : memref<16x8xf32, #tpu.memory_space<vmem>>, vector<16x8xf32>
    %cst_5 = arith.constant dense<0.000000e+00> : vector<2x8xf32>
    %5 = tpu.matmul %3, %4, %cst_5 {dimension_numbers = #tpu.dot_dimension_numbers<[1], [0], [0], [1], [0, 0, 1, 1], [], []>} : vector<2x16xf32>, vector<16x8xf32>, vector<2x8xf32> -> vector<2x8xf32>
    %c0_6 = arith.constant 0 : index
    %c0_7 = arith.constant 0 : index
    %6 = vector.load %arg3[%c0_6, %c0_7] : memref<1x8xf32, #tpu.memory_space<vmem>>, vector<1x8xf32>
    %7 = vector.broadcast %6 : vector<1x8xf32> to vector<2x8xf32>
    %8 = arith.addf %5, %7 : vector<2x8xf32>
    %cst_8 = arith.constant 0.000000e+00 : f32
    %9 = vector.broadcast %cst_8 : f32 to vector<2x8xf32>
    %10 = arith.maximumf %8, %9 : vector<2x8xf32>
    %c0_9 = arith.constant 0 : index
    %c0_10 = arith.constant 0 : index
    %11 = vector.load %arg4[%c0_9, %c0_10] : memref<8x16xf32, #tpu.memory_space<vmem>>, vector<8x16xf32>
    %cst_11 = arith.constant dense<0.000000e+00> : vector<2x16xf32>
    %12 = tpu.matmul %10, %11, %cst_11 {dimension_numbers = #tpu.dot_dimension_numbers<[1], [0], [0], [1], [0, 0, 1, 1], [], []>} : vector<2x8xf32>, vector<8x16xf32>, vector<2x16xf32> -> vector<2x16xf32>
    %c0_12 = arith.constant 0 : index
    %c0_13 = arith.constant 0 : index
    %13 = vector.load %arg5[%c0_12, %c0_13] : memref<1x16xf32, #tpu.memory_space<vmem>>, vector<1x16xf32>
    %14 = vector.broadcast %13 : vector<1x16xf32> to vector<2x16xf32>
    %15 = arith.addf %12, %14 : vector<2x16xf32>
    %cst_14 = arith.constant 3.000000e+00 : f32
    %16 = vector.broadcast %cst_14 : f32 to vector<2x16xf32>
    %17 = arith.addf %15, %16 : vector<2x16xf32>
    %cst_15 = arith.constant 0.000000e+00 : f32
    %18 = vector.broadcast %cst_15 : f32 to vector<2x16xf32>
    %19 = arith.maximumf %17, %18 : vector<2x16xf32>
    %cst_16 = arith.constant 6.000000e+00 : f32
    %20 = vector.broadcast %cst_16 : f32 to vector<2x16xf32>
    %21 = arith.minimumf %19, %20 : vector<2x16xf32>
    %cst_17 = arith.constant 0.166666672 : f32
    %22 = vector.broadcast %cst_17 : f32 to vector<2x16xf32>
    %23 = arith.mulf %21, %22 : vector<2x16xf32>
    %24 = vector.shape_cast %23 : vector<2x16xf32> to vector<2x16x1xf32>
    %c0_18 = arith.constant 0 : index
    %c0_19 = arith.constant 0 : index
    %c0_20 = arith.constant 0 : index
    %25 = vector.load %arg1[%c0_18, %c0_19, %c0_20] : memref<2x16x196xf32, #tpu.memory_space<vmem>>, vector<2x16x196xf32>
    %26 = vector.broadcast %24 : vector<2x16x1xf32> to vector<2x16x196xf32>
    %27 = arith.mulf %25, %26 : vector<2x16x196xf32>
    %c0_21 = arith.constant 0 : index
    %c0_22 = arith.constant 0 : index
    %c0_23 = arith.constant 0 : index
    %28 = vector.load %arg6[%c0_21, %c0_22, %c0_23] : memref<2x16x196xf32, #tpu.memory_space<vmem>>, vector<2x16x196xf32>
    tpu.vector_store %arg6[%c0_21, %c0_22, %c0_23], %27 {strides = array<i32>} : memref<2x16x196xf32, #tpu.memory_space<vmem>>, vector<2x16x196xf32>,
    return
  }
  func.func @transform_0(%arg0: i32) -> (i32, i32, i32) {
    %c0_i32 = arith.constant 0 : i32
    %c0_i32_0 = arith.constant 0 : i32
    %c0_i32_1 = arith.constant 0 : i32
    return %arg0, %c0_i32, %c0_i32_0 : i32, i32, i32
  }
  func.func @transform_1(%arg0: i32) -> (i32, i32) {
    %c0_i32 = arith.constant 0 : i32
    %c0_i32_0 = arith.constant 0 : i32
    %c0_i32_1 = arith.constant 0 : i32
    return %c0_i32, %c0_i32_0 : i32, i32
  }
  func.func @transform_2(%arg0: i32) -> (i32, i32) {
    %c0_i32 = arith.constant 0 : i32
    %c0_i32_0 = arith.constant 0 : i32
    %c0_i32_1 = arith.constant 0 : i32
    return %c0_i32, %c0_i32_0 : i32, i32
  }
  func.func @transform_3(%arg0: i32) -> (i32, i32) {
    %c0_i32 = arith.constant 0 : i32
    %c0_i32_0 = arith.constant 0 : i32
    %c0_i32_1 = arith.constant 0 : i32
    return %c0_i32, %c0_i32_0 : i32, i32
  }
  func.func @transform_4(%arg0: i32) -> (i32, i32) {
    %c0_i32 = arith.constant 0 : i32
    %c0_i32_0 = arith.constant 0 : i32
    %c0_i32_1 = arith.constant 0 : i32
    return %c0_i32, %c0_i32_0 : i32, i32
  }
  func.func @transform_5(%arg0: i32) -> (i32, i32, i32) {
    %c0_i32 = arith.constant 0 : i32
    %c0_i32_0 = arith.constant 0 : i32
    %c0_i32_1 = arith.constant 0 : i32
    return %arg0, %c0_i32, %c0_i32_0 : i32, i32, i32
  }
}

</mosaic_0001>

<bundles_post_ra>
// kernel: tpu_custom_call.1
= control target key start
LH: loop header
LB: loop body
LE: loop exit
PB: predicated region body
PF: predicated region fallthrough
CT: control target
= control target key end

     0   :  { %10 = vsyncpa [#allocation3], 0  ;;  %s517_s0 = inlined_call_operand.hbm [shape: f32[2,16,196], index: 0, kind: input, shape index: {}]   ;;  %s518_s1 = inlined_call_operand.vmem [shape: f32[16,8], index: 1, kind: input, shape index: {}]   ;;  %s519_s2 = inlined_call_operand.vmem [shape: f32[1,8], index: 2, kind: input, shape index: {}]   ;;  %s520_s3 = inlined_call_operand.vmem [shape: f32[8,16], index: 3, kind: input, shape index: {}]   ;;  %s521_s4 = inlined_call_operand.vmem [shape: f32[1,16], index: 4, kind: input, shape index: {}]   ;;  %s522_s5 = inlined_call_operand.hbm [shape: f32[2,16,196], index: 5, kind: output, shape index: {}]  }
   0x1   :  { %11 = vsyncpa [#allocation4], 0  ;;  %s395_s18 = smov [#allocation2]   ;;  %s347_s22 = scalar_lea.hbm %s517_s0, 1024 }
   0x2   :  { %s17_s19 = sshll.u32 %s395_s18, 4  ;;  %p348_p0 = scmp.ne.s32.totalorder %s517_s0, %s347_s22  ;;  %s18_s19 = int_to_ptr.vmem [resolvable:$true] %s17_s19 }
   0x3   :  { %p351_p1 = scmp.lt.u32.totalorder %s347_s22, %s517_s0 }
   0x5   :  { %p353_p2 = pnand %p351_p1, %p348_p0 }
   0x7   :  { %356 = shalt.err (!%p353_p2)
}
   0x8   :  { %s357_s27 = scalar_lea.vmem %s18_s19, 1024  ;;  %p362_p4 = scmp.lt.s32.totalorder %s18_s19, %s18_s19 }
   0x9   :  { %p358_p3 = scmp.ne.s32.totalorder %s18_s19, %s357_s27  ;;  %p363_p5 = scmp.lt.s32.totalorder %s357_s27, %s357_s27 }
   0xb   :  { %p364_p6 = por %p363_p5, %p362_p4 }
   0xd   :  { %p365_p7 = pnand %p364_p6, %p358_p3 }
   0xf   :  { %368 = shalt.err (!%p365_p7)
}
  0x10   :  { %s396_s28 = smov 256   ;;  %s397_s29 = smov 16  }
  0x11   :  { %23 = dma.hbm_to_vmem [thread:$0]  %s517_s0, 1024, %s18_s19, [#allocation3], %s396_s28, %s396_s28, %s397_s29  }
  0x12   :  { %391 = dma.done.wait [#allocation3], 1024  }
  0x13   :  { %392 = vsyncadd [#allocation3], 4294966272  ;;  %vm43_vm0 = vcmask 556032   ;;  %v447_v0 = vld [vmem:[#allocation2 + $0x20] sm:$0xff]  ;;  %v449_v1 = vld [vmem:[#allocation2 + $0x28] sm:$0xff]  ;;  %v398_v19 = vmov 0.0|0.0   ;;  %v77_v21 = vlaneseq }
  0x14   :  { %v451_v2 = vld [vmem:[#allocation2] sm:$0xff]  ;;  %v52_v3 = vsel %vm43_vm0, %v449_v1, 0.0  ;;  %v455_v4 = vld [vmem:[#allocation2 + $0x8] sm:$0xff]  ;;  %v457_v5 = vld [vmem:[#allocation2 + $0x30] sm:$0xff]  ;;  %337 = vmatprep.subr.bf16.mxu0 %v398_v19  ;;  %vm399_vm1 = vmmov 0   ;;  %v400_v20 = vmov 0.0  }
  0x15   :  { %v459_v6 = vld [vmem:[#allocation2 + $0x38] sm:$0xff]  ;;  %v53_v7 = vadd.f32 %v52_v3, %v447_v0  ;;  %v44_v8 = vsel %vm43_vm0, %v455_v4, 0.0  ;;  %v466_v10 = vld [vmem:[#allocation2 + $0x10] sm:$0xff]  ;;  %v64_v16 = vld [vmem:[%s518_s1] sm:$0xff]  ;;  %329 = vmatprep.mubr.msk.f32.mxu0 %vm399_vm1, %v400_v20  ;;  %332 = vmatprep.subr.mxu1 %v400_v20  ;;  %v78_v22 = vand.u32 127, %v77_v21  ;;  %v80_v23 = vshrl.u32 %v77_v21, 7 }
  0x16   :  { %v56_v9 = vsel %vm43_vm0, %v459_v6, 0.0  ;;  %v468_v11 = vld [vmem:[#allocation2 + $0x18] sm:$0xff]  ;;  %v45_v12 = vadd.f32 %v44_v8, %v451_v2  ;;  %v65_v17 = vld [vmem:[%s518_s1 + $0x8] sm:$0xff]  ;;  %334 = vmatprep.mubr.msk.f32.mxu1 %vm399_vm1, %v400_v20  ;;  %vm88_vm2 = vcmask 130112   ;;  %vm99_vm3 = vcmask 1041409   ;;  %v175_v42 = vld [vmem:[%s520_s3] sm:$0xff] }
  0x17   :  { %v48_v13 = vsel %vm43_vm0, %v468_v11, 0.0  ;;  %54 = vadd.xlane.f32.xlu1 %v53_v7  ;;  %v57_v14 = vadd.f32 %v56_v9, %v457_v5  ;;  %v338_v18 = vpack.c.bf16 %v65_v17, %v64_v16  ;;  %v83_v24 = vadd.s32 4294967288, %v78_v22  ;;  %333 = vmatpush3.msra.mxu1 %v175_v42  ;;  %v316_v43 = vld [vmem:[%s519_s2] ss:$0 sm:$0xff]  ;;  %s401_s2 = smov [#allocation5]  }
  0x18   :  { %46 = vadd.xlane.f32.xlu0 %v45_v12  ;;  %v49_v15 = vadd.f32 %v48_v13, %v466_v10  ;;  %v81_v27 = vsub.s32 %v78_v22, %v80_v23  ;;  %vm101_vm4 = vcmask 130048   ;;  %vm183_vm5 = vcmask 64512   ;;  %v318_v48 = vld [vmem:[%s521_s4] ss:$0 sm:$0xff]  ;;  %s304_s3 = sshll.u32 %s401_s2, 4  ;;  %s305_s3 = int_to_ptr.vmem [resolvable:$true] %s304_s3 }
  0x19   :  { %339 = vmatpush3.bf16.msra.mxu0 %v338_v18  ;;  %v86_v29 = vsub.s32 %v83_v24, %v80_v23  ;;  %v263_v55 = vsub.s32 0, %v80_v23  ;;  %v274_v58 = vsub.s32 1, %v80_v23  ;;  %s369_s4 = scalar_lea.vmem %s305_s3, 1024  ;;  %p374_p9 = scmp.lt.s32.totalorder %s305_s3, %s305_s3 }
  0x1a   :  { %p370_p8 = scmp.ne.s32.totalorder %s305_s3, %s369_s4  ;;  %p375_p10 = scmp.lt.s32.totalorder %s369_s4, %s369_s4 }
  0x1b   :  { %58 = vadd.xlane.f32.xlu1 %v57_v14 }
  0x1c   :  { %50 = vadd.xlane.f32.xlu0 %v49_v15  ;;  %p376_p11 = por %p375_p10, %p374_p9 }
  0x1e   :  { %p377_p12 = pnand %p376_p11, %p370_p8 }
  0xa4   :  { %v55_v25 = vpop.xlane.xlu1 %54 }
  0xa5   :  { %v47_v26 = vpop.xlane.xlu0 %46  ;;  %v62_v28 = vmul.f32 0.0051020407, %v55_v25 }
  0xa6   :  { %v60_v30 = vmul.f32 0.0051020407, %v47_v26 }
  0xa7   :  { %v93_v35 = vrot.slane %v62_v28, %v81_v27 }
  0xa8   :  { %v59_v31 = vpop.xlane.xlu1 %58  ;;  %v82_v37 = vrot.slane %v60_v30, %v81_v27 }
  0xa9   :  { %v63_v32 = vmul.f32 0.0051020407, %v59_v31  ;;  %v51_v33 = vpop.xlane.xlu0 %50 }
  0xaa   :  { %v61_v34 = vmul.f32 0.0051020407, %v51_v33 }
  0xab   :  { %v97_v36 = vrot.slane %v63_v32, %v86_v29 }
  0xac   :  { %v87_v38 = vrot.slane %v61_v34, %v86_v29 }
  0xad   :  { %v98_v39 = vsel %vm88_vm2, %v97_v36, %v93_v35 }
  0xae   :  { %v89_v40 = vsel %vm88_vm2, %v87_v38, %v82_v37 }
  0xaf   :  { %v100_v41 = vsel %vm99_vm3, %v98_v39, %v89_v40 }
  0xb0   :  { %330 = vmatmul.mubr.msk.f32.vlgmr.msra.gmra.mrb[0].mxu0 %vm101_vm4, %v100_v41 }
 0x183   :  { %v170_v44 = vpop.f32.mrb[0].mxu0 }
 0x184   :  { %v171_v45 = vadd.f32 %v316_v43, %v170_v44  ;;  %v331_v46 = vpop.f32.mrb[1].mxu0 }
 0x186   :  { %v174_v47 = vmax.f32 %v171_v45, 0.0 }
 0x188   :  { %335 = vmatmul.mubr.msk.f32.vlgmr.msra.gmra.mrb[0].mxu1 %vm183_vm5, %v174_v47 }
 0x25b   :  { %v253_v49 = vpop.f32.mrb[0].mxu1 }
 0x25c   :  { %v254_v50 = vadd.f32 %v318_v48, %v253_v49  ;;  %v336_v51 = vpop.f32.mrb[1].mxu1 }
 0x25e   :  { %v257_v52 = vadd.f32 3.0, %v254_v50 }
 0x260   :  { %v258_v53 = vmax.f32 %v257_v52, 0.0 }
 0x262   :  { %v259_v54 = vmin.f32 %v258_v53, 6.0 }
 0x264   :  { %v260_v56 = vmul.f32 0.16666667, %v259_v54 }
 0x266   :  { %v264_v57 = vrot.slane %v260_v56, %v263_v55  ;;  %v275_v59 = vrot.slane %v260_v56, %v274_v58 }
 0x268   :  { %270 = vbcast.lane.b32.xlu1 %v264_v57, 264  ;;  %266 = vbcast.lane.b32.xlu0 %v264_v57, 256 }
 0x26c   :  { %277 = vbcast.lane.b32.xlu1 %v275_v59, 256 }
 0x270   :  { %281 = vbcast.lane.b32.xlu1 %v275_v59, 264 }
 0x2da   :  { %v271_v60 = vpop.permute.xlu1 %270  ;;  %v267_v61 = vpop.permute.xlu0 %266 }
 0x2db   :  { %v285_v62 = vmul.f32 %v271_v60, %v466_v10  ;;  %v286_v63 = vmul.f32 %v271_v60, %v468_v11  ;;  %v283_v3 = vmul.f32 %v267_v61, %v451_v2  ;;  %v284_v7 = vmul.f32 %v267_v61, %v455_v4 }
 0x2dd   :  { %293 = vst [vmem:[#allocation5 + $0x10] sm:$0xff] %v285_v62  ;;  %294 = vst.msk [vmem:[#allocation5 + $0x18] sm:$0xff] %vm43_vm0, %v286_v63 }
 0x2de   :  { %291 = vst [vmem:[#allocation5] sm:$0xff] %v283_v3  ;;  %292 = vst.msk [vmem:[#allocation5 + $0x8] sm:$0xff] %vm43_vm0, %v284_v7  ;;  %v278_v8 = vpop.permute.xlu1 %277 }
 0x2df   :  { %v287_v9 = vmul.f32 %v278_v8, %v447_v0  ;;  %v288_v12 = vmul.f32 %v278_v8, %v449_v1 }
 0x2e1   :  { %295 = vst [vmem:[#allocation5 + $0x20] sm:$0xff] %v287_v9  ;;  %296 = vst.msk [vmem:[#allocation5 + $0x28] sm:$0xff] %vm43_vm0, %v288_v12 }
 0x2e2   :  { %v282_v10 = vpop.permute.xlu1 %281 }
 0x2e3   :  { %v289_v2 = vmul.f32 %v282_v10, %v457_v5  ;;  %v290_v4 = vmul.f32 %v282_v10, %v459_v6 }
 0x2e5   :  { %297 = vst [vmem:[#allocation5 + $0x30] sm:$0xff] %v289_v2  ;;  %298 = vst.msk [vmem:[#allocation5 + $0x38] sm:$0xff] %vm43_vm0, %v290_v4 }
 0x2e6   :  { %380 = shalt.err (!%p377_p12)
}
 0x2e7   :  { %s381_s17 = scalar_lea.hbm %s522_s5, 1024 }
 0x2e8   :  { %p382_p13 = scmp.ne.s32.totalorder %s522_s5, %s381_s17  ;;  %p385_p0 = scmp.lt.u32.totalorder %s381_s17, %s522_s5 }
 0x2ea   :  { %p387_p1 = pnand %p385_p0, %p382_p13 }
 0x2ec   :  { %390 = shalt.err (!%p387_p1)
}
 0x2ed   :  { %310 = dma.vmem_to_hbm [thread:$0]  %s305_s3, 1024, %s522_s5, [#allocation4], %s396_s28, %s396_s28, %s397_s29  }
 0x2ee   :  { %393 = dma.done.wait [#allocation4], 1024  }
 0x2ef   :  { %394 = vsyncadd [#allocation4], 4294966272 }
 0x2f0   :  { %314 = vsyncpa [#allocation3], 1 }
 0x2f1   :  { %315 = vsyncpa [#allocation4], 1 }

</bundles_post_ra>
